<compile_context>
chip_gen: v5e
topology: v5e:2x2
jax: 0.10.0
libtpu: 0.0.40
codegen_flags: <defaults>
</compile_context>

<pallas_src>
import functools

import jax
import jax.numpy as jnp
from jax import lax
from jax.experimental import pallas as pl
from jax.experimental.pallas import tpu as pltpu


# ---------------------------------------------------------------------------
# Config (small, but exercises every branch of the module: embedding_size !=
# hidden_size so embed_proj runs, type_vocab_size > 0, position_biased_input).
# ---------------------------------------------------------------------------
class Config:
    vocab_size = 100
    hidden_size = 64
    embedding_size = 32
    max_position_embeddings = 128
    type_vocab_size = 2
    pad_token_id = 0
    position_biased_input = True
    layer_norm_eps = 1e-7
    hidden_dropout_prob = 0.1  # identity at inference


def _round_up(x, m):
    return ((x + m - 1) // m) * m


# ---------------------------------------------------------------------------
# Pallas kernel: projection matmul + LayerNorm + mask multiply over row tiles.
# ---------------------------------------------------------------------------
def _deberta_embed_kernel(x_ref,        # (TN, E)  pre-summed embedding slab
                          w_ref,        # (E, Hp)  embed_proj weight (zero-padded cols)
                          gamma_ref,    # (1, Hp)  LayerNorm gamma (zero-padded)
                          beta_ref,     # (1, Hp)  LayerNorm beta  (zero-padded)
                          mask_ref,     # (TN, 1)
                          out_ref,      # (TN, Hp)
                          *, eps, h_real, h_pad):
    # embed_proj (Linear, bias=False): (TN, E) @ (E, Hp) -> (TN, Hp)   [MXU]
    h = jnp.dot(x_ref[...], w_ref[...], preferred_element_type=jnp.float32)

    # LayerNorm over the REAL hidden width; padded weight columns are zero so
    # the padded lanes of h are exactly zero and drop out of the mean.  The
    # variance excludes padded lanes explicitly.  Statistics always in f32.
    inv_h = jnp.float32(1.0 / h_real)
    mu = jnp.sum(h, axis=-1, keepdims=True) * inv_h
    xc = h - mu
    if h_pad != h_real:
        lane = lax.broadcasted_iota(jnp.int32, h.shape, 1)
        sq = jnp.where(lane < h_real, xc * xc, 0.0)
    else:
        sq = xc * xc
    var = jnp.sum(sq, axis=-1, keepdims=True) * inv_h

    y = xc * lax.rsqrt(var + eps)
    y = y * gamma_ref[...] + beta_ref[...]      # padded lanes -> 0 (gamma/beta pads are 0)
    y = y * mask_ref[...]                        # attention-mask multiply (per-row)
    out_ref[...] = y.astype(out_ref.dtype)


# ---------------------------------------------------------------------------
# Wrapper: gathers + pre-sum + padding in plain JAX, hot path in Pallas.
# ---------------------------------------------------------------------------
def deberta_v2_embeddings_forward(params, input_ids, token_type_ids=None,
                                  position_ids=None, mask=None, *,
                                  config=Config, row_tile=None,
                                  compute_dtype=jnp.float32):
    B, S = input_ids.shape
    E = config.embedding_size
    H = config.hidden_size
    N = B * S

    if position_ids is None:
        position_ids = jnp.broadcast_to(
            jnp.arange(S, dtype=jnp.int32)[None, :], (B, S))
    if token_type_ids is None:
        token_type_ids = jnp.zeros((B, S), dtype=jnp.int32)
    if mask is None:
        mask = jnp.ones((B, S), dtype=jnp.float32)

    flat_ids = input_ids.reshape(N)
    flat_pos = position_ids.reshape(N)
    flat_tok = token_type_ids.reshape(N)

    # Pre-sum the embedding streams (fused into the gathers by XLA): 1 slab.
    x = (params["word_embeddings"][flat_ids]
         + params["word_embeddings_delta"][flat_ids])
    if config.position_biased_input:
        x = x + params["position_embeddings"][flat_pos]
    if config.type_vocab_size > 0:
        x = x + params["token_type_embeddings"][flat_tok]
    x = x.astype(compute_dtype)                                   # (N, E)

    # embed_proj weight is stored pre-transposed (E, H) once at init; if the
    # module has no projection (E == H), feed an identity through the MXU.
    if "embed_proj_w_t" in params:
        w_proj = params["embed_proj_w_t"]
    else:
        w_proj = jnp.eye(E, dtype=jnp.float32)
    w_proj = w_proj.astype(compute_dtype)                         # (E, H)

    # Lane-dense output: pad hidden dim to a multiple of 128 with zero weight
    # columns / zero gamma / zero beta; sliced back off after the call.
    Hp = _round_up(max(H, 128), 128)
    gamma = params["ln_gamma"].astype(jnp.float32)
    beta = params["ln_beta"].astype(jnp.float32)
    if Hp != H:
        w_proj = jnp.pad(w_proj, ((0, 0), (0, Hp - H)))
        gamma = jnp.pad(gamma, (0, Hp - H))
        beta = jnp.pad(beta, (0, Hp - H))
    gamma = gamma.reshape(1, Hp)
    beta = beta.reshape(1, Hp)

    mask2d = mask.reshape(N, 1).astype(jnp.float32)

    # Large row tiles (target 512) to amortize per-step overhead; align to the
    # sublane packing of the compute dtype, and pad N so there are no partial
    # (ghost) blocks.
    row_align = 16 if compute_dtype == jnp.bfloat16 else 8
    if row_tile is None:
        row_tile = min(512, _round_up(N, row_align))
    row_tile = _round_up(row_tile, row_align)
    Np = _round_up(N, row_tile)
    if Np != N:
        x = jnp.pad(x, ((0, Np - N), (0, 0)))
        mask2d = jnp.pad(mask2d, ((0, Np - N), (0, 0)))

    grid = (Np // row_tile,)

    x_spec = pl.BlockSpec((row_tile, E), lambda i: (i, 0))
    w_spec = pl.BlockSpec((E, Hp), lambda i: (0, 0))
    vec_spec = pl.BlockSpec((1, Hp), lambda i: (0, 0))
    mask_spec = pl.BlockSpec((row_tile, 1), lambda i: (i, 0))
    out_spec = pl.BlockSpec((row_tile, Hp), lambda i: (i, 0))

    kernel = functools.partial(_deberta_embed_kernel,
                               eps=config.layer_norm_eps,
                               h_real=H, h_pad=Hp)

    out_flat = pl.pallas_call(
        kernel,
        out_shape=jax.ShapeDtypeStruct((Np, Hp), jnp.float32),
        grid_spec=pltpu.PrefetchScalarGridSpec(
            num_scalar_prefetch=0,
            grid=grid,
            in_specs=[x_spec, w_spec, vec_spec, vec_spec, mask_spec],
            out_specs=out_spec,
        ),
        compiler_params=pltpu.CompilerParams(
            dimension_semantics=("parallel",)),  # row axis shards across TCs (v7x megacore)
    )(x, w_proj, gamma, beta, mask2d)

    return out_flat[:N, :H].reshape(B, S, H)


# ---------------------------------------------------------------------------
# Deterministic parameter init (shapes match the module's __init__).
# ---------------------------------------------------------------------------
def init_params(key, config=Config):
    E, H = config.embedding_size, config.hidden_size
    ks = jax.random.split(key, 6)
    we = 0.02 * jax.random.normal(ks[0], (config.vocab_size, E), jnp.float32)
    wd = 0.02 * jax.random.normal(ks[1], (config.vocab_size, E), jnp.float32)
    # padding_idx row is zero-initialized in nn.Embedding
    we = we.at[config.pad_token_id].set(0.0)
    wd = wd.at[config.pad_token_id].set(0.0)
    pe = 0.02 * jax.random.normal(ks[2], (config.max_position_embeddings, E), jnp.float32)
    te = 0.02 * jax.random.normal(ks[3], (config.type_vocab_size, E), jnp.float32)
    w_proj = 0.02 * jax.random.normal(ks[4], (H, E), jnp.float32)   # nn.Linear weight (H, E)
    gamma = jnp.ones((H,), jnp.float32)
    beta = jnp.zeros((H,), jnp.float32)
    return {
        "word_embeddings": we,
        "word_embeddings_delta": wd,
        "position_embeddings": pe,
        "token_type_embeddings": te,
        "embed_proj_w": w_proj,          # Linear layout (H, E) — used by the reference
        "embed_proj_w_t": w_proj.T,      # pre-transposed (E, H) — used by the kernel (hoisted once)
        "ln_gamma": gamma,
        "ln_beta": beta,
    }


# ---------------------------------------------------------------------------
# Pure-JAX reference (mirrors the PyTorch forward) for correctness check.
# ---------------------------------------------------------------------------
def reference_forward(params, input_ids, token_type_ids, position_ids, mask,
                      config=Config):
    x = params["word_embeddings"][input_ids] + params["word_embeddings_delta"][input_ids]
    x = x + params["position_embeddings"][position_ids]
    x = x + params["token_type_embeddings"][token_type_ids]
    x = x @ params["embed_proj_w"].T
    mu = jnp.mean(x, axis=-1, keepdims=True)
    var = jnp.mean((x - mu) ** 2, axis=-1, keepdims=True)
    y = (x - mu) / jnp.sqrt(var + config.layer_norm_eps)
    y = y * params["ln_gamma"] + params["ln_beta"]
    y = y * mask[..., None].astype(y.dtype)
    return y


if __name__ == "__main__":
    cfg = Config
    B, S = 2, 8
    key = jax.random.PRNGKey(0)
    k_param, k_ids, k_tok, k_mask = jax.random.split(key, 4)

    params = init_params(k_param, cfg)
    input_ids = jax.random.randint(k_ids, (B, S), 0, cfg.vocab_size, dtype=jnp.int32)
    token_type_ids = jax.random.randint(k_tok, (B, S), 0, cfg.type_vocab_size, dtype=jnp.int32)
    position_ids = jnp.broadcast_to(jnp.arange(S, dtype=jnp.int32)[None, :], (B, S))
    mask = (jax.random.uniform(k_mask, (B, S)) > 0.2).astype(jnp.float32)

    ref = reference_forward(params, input_ids, token_type_ids, position_ids, mask, cfg)

    # f32 path (default): bit-accurate check against the reference.
    out = deberta_v2_embeddings_forward(params, input_ids, token_type_ids,
                                        position_ids, mask, config=cfg)
    out = jax.block_until_ready(out)
    assert out.shape == (B, S, cfg.hidden_size)
    assert jnp.allclose(out, ref, atol=1e-4, rtol=1e-4), "f32 mismatch vs reference"

    # bf16 slab/weight path (v6e/v7x HBM-bytes optimization); LN stats in f32.
    out_bf16 = deberta_v2_embeddings_forward(params, input_ids, token_type_ids,
                                             position_ids, mask, config=cfg,
                                             compute_dtype=jnp.bfloat16)
    out_bf16 = jax.block_until_ready(out_bf16)
    assert out_bf16.shape == (B, S, cfg.hidden_size)
    assert bool(jnp.all(jnp.isfinite(out_bf16)))
    assert jnp.allclose(out_bf16, ref, atol=1e-1, rtol=1e-1), "bf16 mismatch vs reference"

    print("KERNEL_OK")
</pallas_src>

<mosaic_0001>
module attributes {stable_mosaic.version = 11 : i64} {
  func.func @_deberta_embed_kernel(%arg0: i32, %arg1: memref<16x32xf32, #tpu.memory_space<vmem>>, %arg2: memref<32x128xf32, #tpu.memory_space<vmem>>, %arg3: memref<1x128xf32, #tpu.memory_space<vmem>>, %arg4: memref<1x128xf32, #tpu.memory_space<vmem>>, %arg5: memref<16x1xf32, #tpu.memory_space<vmem>>, %arg6: memref<16x128xf32, #tpu.memory_space<vmem>>) attributes {dimension_semantics = [#tpu.dimension_semantics<parallel>], iteration_bounds = array<i64: 1>, scalar_prefetch = 0 : i64, scratch_operands = 0 : i64, tpu.core_type = #tpu.core_type<tc>, window_params = [{transform_indices = @transform_0, window_bounds = array<i64: 16, 32>}, {pipeline_mode = #tpu.pipeline_mode<synchronous>, transform_indices = @transform_1, window_bounds = array<i64: 32, 128>}, {pipeline_mode = #tpu.pipeline_mode<synchronous>, transform_indices = @transform_2, window_bounds = array<i64: 1, 128>}, {pipeline_mode = #tpu.pipeline_mode<synchronous>, transform_indices = @transform_3, window_bounds = array<i64: 1, 128>}, {transform_indices = @transform_4, window_bounds = array<i64: 16, 1>}, {transform_indices = @transform_5, window_bounds = array<i64: 16, 128>}]} {
    %c0 = arith.constant 0 : index
    %c0_0 = arith.constant 0 : index
    %0 = vector.load %arg1[%c0, %c0_0] : memref<16x32xf32, #tpu.memory_space<vmem>>, vector<16x32xf32>
    %c0_1 = arith.constant 0 : index
    %c0_2 = arith.constant 0 : index
    %1 = vector.load %arg2[%c0_1, %c0_2] : memref<32x128xf32, #tpu.memory_space<vmem>>, vector<32x128xf32>
    %cst = arith.constant dense<0.000000e+00> : vector<16x128xf32>
    %2 = tpu.matmul %0, %1, %cst {dimension_numbers = #tpu.dot_dimension_numbers<[1], [0], [0], [1], [0, 0, 1, 1], [], []>} : vector<16x32xf32>, vector<32x128xf32>, vector<16x128xf32> -> vector<16x128xf32>
    %cst_3 = arith.constant dense<0.000000e+00> : vector<16xf32>
    %3 = vector.multi_reduction <add>, %2, %cst_3 [1] : vector<16x128xf32> to vector<16xf32>
    %4 = vector.shape_cast %3 : vector<16xf32> to vector<16x1xf32>
    %cst_4 = arith.constant 1.562500e-02 : f32
    %5 = vector.broadcast %cst_4 : f32 to vector<16x1xf32>
    %6 = arith.mulf %4, %5 : vector<16x1xf32>
    %7 = vector.broadcast %6 : vector<16x1xf32> to vector<16x128xf32>
    %8 = arith.subf %2, %7 : vector<16x128xf32>
    %9 = tpu.iota {dimensions = array<i32: 1>} : vector<16x128xi32>
    %c64_i32 = arith.constant 64 : i32
    %10 = vector.broadcast %c64_i32 : i32 to vector<16x128xi32>
    %11 = arith.cmpi slt, %9, %10 : vector<16x128xi32>
    %12 = arith.mulf %8, %8 : vector<16x128xf32>
    %cst_5 = arith.constant 0.000000e+00 : f32
    %13 = vector.broadcast %cst_5 : f32 to vector<16x128xf32>
    %14 = arith.select %11, %12, %13 : vector<16x128xi1>, vector<16x128xf32>
    %cst_6 = arith.constant dense<0.000000e+00> : vector<16xf32>
    %15 = vector.multi_reduction <add>, %14, %cst_6 [1] : vector<16x128xf32> to vector<16xf32>
    %16 = vector.shape_cast %15 : vector<16xf32> to vector<16x1xf32>
    %cst_7 = arith.constant 1.562500e-02 : f32
    %17 = vector.broadcast %cst_7 : f32 to vector<16x1xf32>
    %18 = arith.mulf %16, %17 : vector<16x1xf32>
    %cst_8 = arith.constant 1.000000e-07 : f32
    %19 = vector.broadcast %cst_8 : f32 to vector<16x1xf32>
    %20 = arith.addf %18, %19 : vector<16x1xf32>
    %21 = math.rsqrt %20 : vector<16x1xf32>
    %22 = vector.broadcast %21 : vector<16x1xf32> to vector<16x128xf32>
    %23 = arith.mulf %8, %22 : vector<16x128xf32>
    %c0_9 = arith.constant 0 : index
    %c0_10 = arith.constant 0 : index
    %24 = vector.load %arg3[%c0_9, %c0_10] : memref<1x128xf32, #tpu.memory_space<vmem>>, vector<1x128xf32>
    %25 = vector.broadcast %24 : vector<1x128xf32> to vector<16x128xf32>
    %26 = arith.mulf %23, %25 : vector<16x128xf32>
    %c0_11 = arith.constant 0 : index
    %c0_12 = arith.constant 0 : index
    %27 = vector.load %arg4[%c0_11, %c0_12] : memref<1x128xf32, #tpu.memory_space<vmem>>, vector<1x128xf32>
    %28 = vector.broadcast %27 : vector<1x128xf32> to vector<16x128xf32>
    %29 = arith.addf %26, %28 : vector<16x128xf32>
    %c0_13 = arith.constant 0 : index
    %c0_14 = arith.constant 0 : index
    %30 = vector.load %arg5[%c0_13, %c0_14] : memref<16x1xf32, #tpu.memory_space<vmem>>, vector<16x1xf32>
    %31 = vector.broadcast %30 : vector<16x1xf32> to vector<16x128xf32>
    %32 = arith.mulf %29, %31 : vector<16x128xf32>
    %c0_15 = arith.constant 0 : index
    %c0_16 = arith.constant 0 : index
    %33 = vector.load %arg6[%c0_15, %c0_16] : memref<16x128xf32, #tpu.memory_space<vmem>>, vector<16x128xf32>
    tpu.vector_store %arg6[%c0_15, %c0_16], %32 {strides = array<i32>} : memref<16x128xf32, #tpu.memory_space<vmem>>, vector<16x128xf32>,
    return
  }
  func.func @transform_0(%arg0: i32) -> (i32, i32) {
    %c0_i32 = arith.constant 0 : i32
    %c0_i32_0 = arith.constant 0 : i32
    return %arg0, %c0_i32 : i32, i32
  }
  func.func @transform_1(%arg0: i32) -> (i32, i32) {
    %c0_i32 = arith.constant 0 : i32
    %c0_i32_0 = arith.constant 0 : i32
    %c0_i32_1 = arith.constant 0 : i32
    return %c0_i32, %c0_i32_0 : i32, i32
  }
  func.func @transform_2(%arg0: i32) -> (i32, i32) {
    %c0_i32 = arith.constant 0 : i32
    %c0_i32_0 = arith.constant 0 : i32
    %c0_i32_1 = arith.constant 0 : i32
    return %c0_i32, %c0_i32_0 : i32, i32
  }
  func.func @transform_3(%arg0: i32) -> (i32, i32) {
    %c0_i32 = arith.constant 0 : i32
    %c0_i32_0 = arith.constant 0 : i32
    %c0_i32_1 = arith.constant 0 : i32
    return %c0_i32, %c0_i32_0 : i32, i32
  }
  func.func @transform_4(%arg0: i32) -> (i32, i32) {
    %c0_i32 = arith.constant 0 : i32
    %c0_i32_0 = arith.constant 0 : i32
    return %arg0, %c0_i32 : i32, i32
  }
  func.func @transform_5(%arg0: i32) -> (i32, i32) {
    %c0_i32 = arith.constant 0 : i32
    %c0_i32_0 = arith.constant 0 : i32
    return %arg0, %c0_i32 : i32, i32
  }
}

</mosaic_0001>

<bundles_post_ra>
// kernel: tpu_custom_call.1
= control target key start
LH: loop header
LB: loop body
LE: loop exit
PB: predicated region body
PF: predicated region fallthrough
CT: control target
= control target key end

     0   :  { %10 = vsyncpa [#allocation3], 0  ;;  %s301_s0 = inlined_call_operand.vmem [shape: f32[16,32], index: 0, kind: input, shape index: {}]   ;;  %s302_s1 = inlined_call_operand.hbm [shape: f32[32,128], index: 1, kind: input, shape index: {}]   ;;  %s303_s2 = inlined_call_operand.vmem [shape: f32[1,128], index: 2, kind: input, shape index: {}]   ;;  %s304_s3 = inlined_call_operand.vmem [shape: f32[1,128], index: 3, kind: input, shape index: {}]   ;;  %s305_s4 = inlined_call_operand.vmem [shape: f32[16,1], index: 4, kind: input, shape index: {}]   ;;  %s306_s5 = inlined_call_operand.hbm [shape: f32[16,128], index: 5, kind: output, shape index: {}]  }
   0x1   :  { %11 = vsyncpa [#allocation4], 0  ;;  %s18_s20 = sshll.u32 %s302_s1, 4  ;;  %s236_s21 = smov [#allocation2]   ;;  %s19_s20 = int_to_ptr.hbm [resolvable:$true] %s18_s20 }
   0x2   :  { %s20_s22 = sshll.u32 %s236_s21, 4  ;;  %s237_s23 = smov 128   ;;  %s21_s22 = int_to_ptr.vmem [resolvable:$true] %s20_s22 }
   0x3   :  { %s238_s24 = smov 8  }
   0x4   :  { %26 = dma.hbm_to_vmem [thread:$0]  %s19_s20, 512, %s21_s22, [#allocation3], %s237_s23, %s237_s23, %s238_s24  }
   0x5   :  { %232 = dma.done.wait [#allocation3], 512  }
   0x6   :  { %233 = vsyncadd [#allocation3], 4294966784  ;;  %v42_v0 = vld [vmem:[#allocation2 + $0x18] sm:$0xff]  ;;  %v41_v1 = vld [vmem:[#allocation2 + $0x10] sm:$0xff]  ;;  %vm43_vm0 = vcmask 261120   ;;  %v239_v9 = vmov 0   ;;  %v81_v11 = vlaneseq }
   0x7   :  { %62 = vmatpush.msra.mxu0 %v42_v0  ;;  %167 = vmatpush.msra.mxu1 %v42_v0  ;;  %v40_v2 = vld [vmem:[#allocation2 + $0x8] sm:$0xff]  ;;  %v39_v3 = vld [vmem:[#allocation2] sm:$0xff] }
   0x8   :  { %v37_v4 = vld [vmem:[%s301_s0] sm:$0xff]  ;;  %v38_v5 = vld [vmem:[%s301_s0 + $0x8] sm:$0xff]  ;;  %176 = vset.pattern.permute.xlu2 %v239_v9  ;;  %177 = vset.pattern.permute.xlu0 %v239_v9  ;;  %v82_v13 = vand.u32 127, %v81_v11 }
   0x9   :  { %63 = vmatpush.msra.mxu0 %v41_v1  ;;  %168 = vmatpush.msra.mxu1 %v41_v1  ;;  %v130_v8 = vld [vmem:[%s305_s4] sm:$0xff]  ;;  %v131_v10 = vld [vmem:[%s305_s4 + $0x8] sm:$0xff] }
   0xa   :  { %134 = vperm.xlu2 %176, %v130_v8   ;;  %vm83_vm1 = vcmp.lt.s32.totalorder %v82_v13, 64  ;;  %v178_v37 = vld [vmem:[%s303_s2] ss:$0 sm:$0xff]  ;;  %s240_s2 = smov [#allocation5]  }
   0xb   :  { %64 = vmatpush.msra.mxu0 %v40_v2  ;;  %169 = vmatpush.msra.mxu1 %v40_v2  ;;  %v179_v41 = vld [vmem:[%s304_s3] ss:$0 sm:$0xff]  ;;  %s150_s9 = sshll.u32 %s240_s2, 4  ;;  %s152_s3 = sshll.u32 %s306_s5, 4  ;;  %s151_s9 = int_to_ptr.vmem [resolvable:$true] %s150_s9  ;;  %s153_s3 = int_to_ptr.hbm [resolvable:$true] %s152_s3 }
   0xd   :  { %65 = vmatpush.msra.mxu0 %v39_v3  ;;  %170 = vmatpush.msra.mxu1 %v39_v3 }
   0xe   :  { %165 = vmatmul.msk.f32.vlgmr.msra.gmra.mxu0 %vm43_vm0, %v37_v4  ;;  %166 = vmatmul.msk.f32.vlgmr.msra.gmra.mxu1 %vm43_vm0, %v38_v5 }
  0x12   :  { %139 = vperm.xlu2 %176, %v131_v10  }
  0x64   :  { %v135_v45 = vpop.permute.xlu2 %134 }
  0x6c   :  { %v140_v53 = vpop.permute.xlu2 %139 }
  0x8b   :  { %v67_v6 = vpop.f32.mrf.mxu0  ;;  %v70_v7 = vpop.f32.mrf.mxu1 }
  0x8c   :  { %73 = vadd.xlane.f32.xlu0 %v67_v6 }
  0x94   :  { %75 = vadd.xlane.f32.xlu0 %v70_v7 }
  0xff   :  { %v74_v12 = vpop.xlane.xlu0 %73 }
 0x100   :  { %v77_v14 = vmul.f32 0.015625, %v74_v12 }
 0x102   :  { %v79_v15 = vsub.f32 %v67_v6, %v77_v14 }
 0x104   :  { %v84_v16 = vmul.f32 %v79_v15, %v79_v15 }
 0x106   :  { %v86_v17 = vsel %vm83_vm1, %v84_v16, 0.0 }
 0x107   :  { %88 = vadd.xlane.f32.xlu1 %v86_v17  ;;  %v76_v18 = vpop.xlane.xlu0 %75 }
 0x108   :  { %v78_v19 = vmul.f32 0.015625, %v76_v18 }
 0x10a   :  { %v80_v20 = vsub.f32 %v70_v7, %v78_v19 }
 0x10c   :  { %v85_v21 = vmul.f32 %v80_v20, %v80_v20 }
 0x10e   :  { %v87_v22 = vsel %vm83_vm1, %v85_v21, 0.0 }
 0x10f   :  { %90 = vadd.xlane.f32.xlu1 %v87_v22 }
 0x17a   :  { %v89_v23 = vpop.xlane.xlu1 %88 }
 0x17b   :  { %v92_v24 = vmul.f32 0.015625, %v89_v23 }
 0x17d   :  { %v94_v25 = vadd.f32 1e-07, %v92_v24 }
 0x17f   :  { %180 = vrsqrt.f32 %v94_v25  ;;  %vm102_vm3 = vweird.f32 %v94_v25 }
 0x182   :  { %v91_v26 = vpop.xlane.xlu1 %90 }
 0x183   :  { %v93_v27 = vmul.f32 0.015625, %v91_v26 }
 0x185   :  { %v181_v28 = vpop.eup %180  ;;  %v95_v29 = vadd.f32 1e-07, %v93_v27 }
 0x186   :  { %v97_v30 = vmul.f32 %v181_v28, %v94_v25  ;;  %vm103_vm2 = vweird.f32 %v181_v28 }
 0x187   :  { %182 = vrsqrt.f32 %v95_v29  ;;  %vm104_vm4 = vmor %vm102_vm3, %vm103_vm2  ;;  %vm112_vm6 = vweird.f32 %v95_v29 }
 0x188   :  { %v98_v31 = vmul.f32 %v181_v28, %v97_v30 }
 0x18a   :  { %v99_v32 = vmul.f32 0.5, %v98_v31 }
 0x18c   :  { %v100_v33 = vsub.f32 1.5, %v99_v32 }
 0x18d   :  { %v183_v34 = vpop.eup %182 }
 0x18e   :  { %v101_v35 = vmul.f32 %v181_v28, %v100_v33  ;;  %v107_v36 = vmul.f32 %v183_v34, %v95_v29  ;;  %vm113_vm5 = vweird.f32 %v183_v34 }
 0x18f   :  { %vm114_vm7 = vmor %vm112_vm6, %vm113_vm5 }
 0x190   :  { %v108_v38 = vmul.f32 %v183_v34, %v107_v36  ;;  %v105_v39 = vsel %vm104_vm4, %v181_v28, %v101_v35 }
 0x191   :  { %v116_v40 = vmul.f32 %v105_v39, %v79_v15 }
 0x192   :  { %v109_v42 = vmul.f32 0.5, %v108_v38 }
 0x193   :  { %v122_v43 = vmul.f32 %v178_v37, %v116_v40 }
 0x194   :  { %v110_v44 = vsub.f32 1.5, %v109_v42 }
 0x195   :  { %v128_v46 = vadd.f32 %v179_v41, %v122_v43 }
 0x196   :  { %v111_v47 = vmul.f32 %v183_v34, %v110_v44 }
 0x197   :  { %v142_v48 = vmul.f32 %v135_v45, %v128_v46 }
 0x198   :  { %v115_v49 = vsel %vm114_vm7, %v183_v34, %v111_v47 }
 0x199   :  { %144 = vst [vmem:[#allocation5] sm:$0xff] %v142_v48  ;;  %v117_v50 = vmul.f32 %v115_v49, %v80_v20 }
 0x19b   :  { %v123_v51 = vmul.f32 %v178_v37, %v117_v50 }
 0x19d   :  { %v129_v52 = vadd.f32 %v179_v41, %v123_v51 }
 0x19f   :  { %v143_v54 = vmul.f32 %v140_v53, %v129_v52 }
 0x1a1   :  { %145 = vst [vmem:[#allocation5 + $0x8] sm:$0xff] %v143_v54 }
 0x1a2   :  { %158 = dma.vmem_to_hbm [thread:$0]  %s151_s9, 256, %s153_s3, [#allocation4], %s237_s23, %s237_s23, %s238_s24  }
 0x1a3   :  { %234 = dma.done.wait [#allocation4], 256  }
 0x1a4   :  { %235 = vsyncadd [#allocation4], 4294967040 }
 0x1a5   :  { %163 = vsyncpa [#allocation3], 1 }
 0x1a6   :  { %164 = vsyncpa [#allocation4], 1 }

</bundles_post_ra>
